<compile_context>
chip_gen: v6e
topology: v6e:2x2x1
jax: 0.10.0
libtpu: 0.0.40
codegen_flags: <defaults>
</compile_context>

<pallas_src>
import math

import numpy as np
import jax
import jax.numpy as jnp
from jax.experimental import pallas as pl
from jax.experimental.pallas import tpu as pltpu


# ---------------------------------------------------------------------------
# Buffer construction (deterministic, host-side numpy "glue", mirrors __init__)
# ---------------------------------------------------------------------------
def soft_grid(res):
    i = np.arange(res, dtype=np.float64)
    betas = (i + 0.5) / res * math.pi
    alphas = i / res * 2 * math.pi
    return betas, alphas


def _assoc_legendre(lmax, x):
    # x: [B] -> P[l, m, B] for 0 <= m <= l (others zero)
    B = x.shape[0]
    P = np.zeros((lmax + 1, lmax + 1, B), dtype=np.float64)
    somx2 = np.sqrt(np.clip(1.0 - x * x, 0.0, None))
    for m in range(lmax + 1):
        if m == 0:
            P[0, 0] = 1.0
        else:
            P[m, m] = -(2 * m - 1) * somx2 * P[m - 1, m - 1]
        if m + 1 <= lmax:
            P[m + 1, m] = (2 * m + 1) * x * P[m, m]
        for l in range(m + 2, lmax + 1):
            P[l, m] = ((2 * l - 1) * x * P[l - 1, m]
                       - (l + m - 1) * P[l - 2, m]) / (l - m)
    return P


def spherical_harmonics_beta_part(lmax, cosbetas):
    # returns [l, m, b], m dimension of size 2*lmax+1 centered at lmax
    P = _assoc_legendre(lmax, cosbetas)
    B = cosbetas.shape[0]
    shb = np.zeros((lmax + 1, 2 * lmax + 1, B), dtype=np.float64)
    for l in range(lmax + 1):
        for m in range(0, l + 1):
            norm = math.sqrt((2 * l + 1) / (4 * math.pi)
                             * math.factorial(l - m) / math.factorial(l + m))
            val = norm * P[l, m]
            shb[l, lmax + m] = val
            shb[l, lmax - m] = val
    return shb


def spherical_harmonics_alpha_part(lmax, alphas):
    # returns [m, a], m runs -lmax..lmax
    A = alphas.shape[0]
    sha = np.zeros((2 * lmax + 1, A), dtype=np.float64)
    for m in range(-lmax, lmax + 1):
        if m < 0:
            sha[lmax + m] = math.sqrt(2) * np.sin(-m * alphas)
        elif m == 0:
            sha[lmax + m] = 1.0
        else:
            sha[lmax + m] = math.sqrt(2) * np.cos(m * alphas)
    return sha


def spherical_harmonics_expand_matrix(lmax):
    # [l, m, i]
    mat = np.zeros((lmax + 1, 2 * lmax + 1, (lmax + 1) ** 2), dtype=np.float64)
    for l in range(lmax + 1):
        mat[l, lmax - l:lmax + l + 1, l ** 2:(l + 1) ** 2] = np.eye(2 * l + 1)
    return mat


def make_to_soft_buffers(lmax, res=None, normalization="component",
                         dtype=jnp.float32):
    """Returns (W [I, B*A], sha [M, A], shb [M, B, I]).

    W fuses both contractions of the forward pass (computed in float64):
        W[i, b*A + a] = sum_m shb[m, b, i] * sha[m, a]
    Pass dtype=jnp.bfloat16 to pre-cast W once for a bf16 compute path
    (avoids a per-call astype HBM pass in to_soft).
    """
    assert normalization in ("norm", "component")
    if res is None:
        res = 2 * (lmax + 1)
    assert res % 2 == 0
    assert res >= 2 * (lmax + 1)
    betas, alphas = soft_grid(res)
    sha = spherical_harmonics_alpha_part(lmax, alphas)            # [m, a]
    shb = spherical_harmonics_beta_part(lmax, np.cos(betas))      # [l, m, b]
    if normalization == "component":
        n = (math.sqrt(4 * math.pi)
             * np.array([1.0 / math.sqrt(2 * l + 1) for l in range(lmax + 1)])
             / math.sqrt(lmax + 1))
    else:  # 'norm'
        n = math.sqrt(4 * math.pi) * np.ones(lmax + 1) / math.sqrt(lmax + 1)
    mexp = spherical_harmonics_expand_matrix(lmax)                # [l, m, i]
    shb = np.einsum("lmb,lmi,l->mbi", shb, mexp, n)               # [m, b, i]

    # Host-side fusion of the two einsums into a single GEMM weight.
    M, B, I = shb.shape
    A = sha.shape[1]
    W = np.einsum("mbi,ma->iba", shb, sha).reshape(I, B * A)      # [i, b*a]

    return (jnp.asarray(W, dtype),
            jnp.asarray(sha, jnp.float32),
            jnp.asarray(shb, jnp.float32))


# ---------------------------------------------------------------------------
# Pallas kernel: one lane-dense MXU GEMM per (Z tile, BA chunk)
# ---------------------------------------------------------------------------
def to_soft_kernel(x_ref, w_ref, o_ref):
    # x_ref: [TZ, I]   w_ref: [I, TBA]   o_ref: [TZ, TBA]
    o_ref[...] = jnp.dot(
        x_ref[...], w_ref[...],
        preferred_element_type=jnp.float32).astype(o_ref.dtype)


def _round_up(n, m):
    return ((n + m - 1) // m) * m


def _largest_divisor_multiple_of(n, upper, step):
    """Largest d <= upper with d % step == 0 and n % d == 0, else None."""
    d = (min(upper, n) // step) * step
    while d >= step:
        if n % d == 0:
            return d
        d -= step
    return None


def _choose_tz(Z, tz_req, *, want_multi_step):
    """Pick a Z tile. Prefer divisors of Z (no pad / out[:Z] HBM passes) and,
    when requested, >= 2 grid steps so the 'parallel' Z axis can be sharded
    across TensorCores (v7x megacore). Returns (tz, Zp)."""
    tz_req = max(8, _round_up(min(tz_req, _round_up(Z, 8)), 8))
    d = _largest_divisor_multiple_of(Z, tz_req, 8)
    if d is None:
        # Z not a multiple of 8 (or no usable divisor): pad as a last resort.
        return tz_req, _round_up(Z, tz_req)
    if want_multi_step and Z // d < 2 and Z >= 512:
        d2 = _largest_divisor_multiple_of(Z, Z // 2, 8)
        if d2 is not None:
            d = d2
    return d, Z


def to_soft(x, w, res_beta, res_alpha, *, tz=2048, compute_dtype=None,
            out_dtype=None, min_pallas_rows=256):
    """x: [..., (lmax+1)^2] -> [..., res_beta, res_alpha].

    w:             fused weight [I, res_beta*res_alpha] from make_to_soft_buffers.
    tz:            requested Z tile (rows of the GEMM); capped by a VMEM budget
                   and adjusted to divide the batch when possible.
    compute_dtype: e.g. jnp.bfloat16 for the MXU inputs (accumulation stays
                   f32). Prefer pre-casting W via make_to_soft_buffers(dtype=).
    out_dtype:     output dtype (e.g. jnp.bfloat16 to halve the dominant
                   output byte stream); defaults to x.dtype.
    """
    size = x.shape[:-1]
    I = x.shape[-1]
    BA = w.shape[1]
    assert w.shape[0] == I
    assert BA == res_beta * res_alpha

    out_dtype = x.dtype if out_dtype is None else out_dtype

    x2 = x.reshape(-1, I)
    Z = x2.shape[0]

    if Z == 0:  # empty batch: nothing to compute
        return jnp.zeros((*size, res_beta, res_alpha), dtype=out_dtype)

    if compute_dtype is not None:
        # NOTE: casting here is an extra HBM read+write as a separate XLA op;
        # pre-cast W once with make_to_soft_buffers(dtype=compute_dtype).
        if x2.dtype != compute_dtype:
            x2 = x2.astype(compute_dtype)
        if w.dtype != compute_dtype:
            w = w.astype(compute_dtype)

    # Tiny batches: pallas_call fixed overhead dominates -> plain XLA GEMM.
    if Z < min_pallas_rows:
        out = jnp.dot(x2, w, preferred_element_type=jnp.float32)
        return out.astype(out_dtype).reshape(*size, res_beta, res_alpha)

    x_isz = jnp.dtype(x2.dtype).itemsize
    w_isz = jnp.dtype(w.dtype).itemsize
    o_isz = jnp.dtype(out_dtype).itemsize

    # ---- BA tiling: guards resident-W / out-tile VMEM at large lmax/res ----
    tba = BA
    if BA % 128 == 0 and BA > 2048:
        tba = _largest_divisor_multiple_of(BA, 2048, 128) or BA
    n_j = BA // tba

    # ---- Z tile: cap by VMEM working-set budget, prefer divisors of Z ------
    budget = 40 * 1024 * 1024                       # double-buffered budget
    per_row = 2 * (I * x_isz + tba * o_isz)         # x-tile + out-tile per row
    w_bytes = 2 * I * tba * w_isz                   # W chunk (2 pipeline bufs)
    max_tz = max(8, ((budget - w_bytes) // per_row) // 8 * 8)
    tz = min(tz, max_tz)
    tz, Zp = _choose_tz(Z, tz, want_multi_step=(n_j == 1))

    if Zp != Z:                                     # last resort: pad
        x2 = jnp.pad(x2, ((0, Zp - Z), (0, 0)))

    footprint = 2 * (tz * I * x_isz + I * tba * w_isz + tz * tba * o_isz)
    cp_kwargs = dict(dimension_semantics=("parallel", "parallel"))
    if footprint > 12 * 1024 * 1024:
        # Only raise the scoped VMEM limit when the footprint needs it
        # (v5e default ~16 MiB scoped; v7x physical VMEM is 64 MiB).
        cp_kwargs["vmem_limit_bytes"] = int(min(footprint + (4 << 20), 60 << 20))

    cost = pl.CostEstimate(
        flops=2 * Zp * I * BA,
        transcendentals=0,
        bytes_accessed=Zp * I * x_isz + I * BA * w_isz + Zp * BA * o_isz)

    out = pl.pallas_call(
        to_soft_kernel,
        out_shape=jax.ShapeDtypeStruct((Zp, BA), out_dtype),
        grid_spec=pltpu.PrefetchScalarGridSpec(
            num_scalar_prefetch=0,
            grid=(Zp // tz, n_j),
            in_specs=[
                pl.BlockSpec((tz, I), lambda i, j: (i, 0)),     # x tile
                pl.BlockSpec((I, tba), lambda i, j: (0, j)),    # fused W chunk
            ],
            out_specs=pl.BlockSpec((tz, tba), lambda i, j: (i, j)),  # lane-dense
        ),
        compiler_params=pltpu.CompilerParams(**cp_kwargs),
        cost_estimate=cost,
    )(x2, w)

    if Zp != Z:
        out = out[:Z]
    return out.reshape(*size, res_beta, res_alpha)


# ---------------------------------------------------------------------------
if __name__ == "__main__":
    lmax = 7
    res = 2 * (lmax + 1)                 # 16  -> B*A = 256 (lane dense)
    I = (lmax + 1) ** 2                  # 64
    W, sha, shb = make_to_soft_buffers(lmax, res, normalization="component")

    key = jax.random.PRNGKey(0)
    k1, k2 = jax.random.split(key)

    def reference(xv):
        # pure-JAX reference of the forward pass (two einsums, same buffers)
        xr = xv.reshape(-1, I)
        tmp = jnp.einsum("mbi,zi->zmb", shb, xr)
        r = jnp.einsum("ma,zmb->zba", sha, tmp)
        return r.reshape(*xv.shape[:-1], res, res)

    # Pallas path: Z = 8*64 = 512 rows -> tz=256, grid=(2, 1), lane-dense out.
    x_big = jax.random.normal(k1, (8, 64, I), dtype=jnp.float32)
    out_big = jax.block_until_ready(to_soft(x_big, W, res, res))
    assert out_big.shape == (8, 64, res, res)
    assert jnp.allclose(out_big, reference(x_big), atol=1e-4, rtol=1e-4)

    # Tiny-batch bypass path (Z=8 < min_pallas_rows): plain XLA GEMM.
    x_small = jax.random.normal(k2, (2, 4, I), dtype=jnp.float32)
    out_small = jax.block_until_ready(to_soft(x_small, W, res, res))
    assert out_small.shape == (2, 4, res, res)
    assert jnp.allclose(out_small, reference(x_small), atol=1e-4, rtol=1e-4)

    print("KERNEL_OK")
</pallas_src>

<mosaic_0001>
module attributes {stable_mosaic.version = 11 : i64} {
  func.func @to_soft_kernel(%arg0: i32, %arg1: i32, %arg2: memref<256x64xf32, #tpu.memory_space<vmem>>, %arg3: memref<64x256xf32, #tpu.memory_space<vmem>>, %arg4: memref<256x256xf32, #tpu.memory_space<vmem>>) attributes {dimension_semantics = [#tpu.dimension_semantics<parallel>, #tpu.dimension_semantics<parallel>], iteration_bounds = array<i64: 2, 1>, scalar_prefetch = 0 : i64, scratch_operands = 0 : i64, tpu.core_type = #tpu.core_type<tc>, window_params = [{transform_indices = @transform_0, window_bounds = array<i64: 256, 64>}, {transform_indices = @transform_1, window_bounds = array<i64: 64, 256>}, {transform_indices = @transform_2, window_bounds = array<i64: 256, 256>}]} {
    %c0 = arith.constant 0 : index
    %c0_0 = arith.constant 0 : index
    %0 = vector.load %arg2[%c0, %c0_0] : memref<256x64xf32, #tpu.memory_space<vmem>>, vector<256x64xf32>
    %c0_1 = arith.constant 0 : index
    %c0_2 = arith.constant 0 : index
    %1 = vector.load %arg3[%c0_1, %c0_2] : memref<64x256xf32, #tpu.memory_space<vmem>>, vector<64x256xf32>
    %cst = arith.constant dense<0.000000e+00> : vector<256x256xf32>
    %2 = tpu.matmul %0, %1, %cst {dimension_numbers = #tpu.dot_dimension_numbers<[1], [0], [0], [1], [0, 0, 1, 1], [], []>} : vector<256x64xf32>, vector<64x256xf32>, vector<256x256xf32> -> vector<256x256xf32>
    %c0_3 = arith.constant 0 : index
    %c0_4 = arith.constant 0 : index
    %3 = vector.load %arg4[%c0_3, %c0_4] : memref<256x256xf32, #tpu.memory_space<vmem>>, vector<256x256xf32>
    tpu.vector_store %arg4[%c0_3, %c0_4], %2 {strides = array<i32>} : memref<256x256xf32, #tpu.memory_space<vmem>>, vector<256x256xf32>,
    return
  }
  func.func @transform_0(%arg0: i32, %arg1: i32) -> (i32, i32) {
    %c0_i32 = arith.constant 0 : i32
    %c0_i32_0 = arith.constant 0 : i32
    return %arg0, %c0_i32 : i32, i32
  }
  func.func @transform_1(%arg0: i32, %arg1: i32) -> (i32, i32) {
    %c0_i32 = arith.constant 0 : i32
    %c0_i32_0 = arith.constant 0 : i32
    return %c0_i32, %arg1 : i32, i32
  }
  func.func @transform_2(%arg0: i32, %arg1: i32) -> (i32, i32) {
    %c0_i32 = arith.constant 0 : i32
    return %arg0, %arg1 : i32, i32
  }
}

</mosaic_0001>

<bundles_post_ra>
// kernel: tpu_custom_call.1
= control target key start
LH: loop header
LB: loop body
LE: loop exit
PB: predicated region body
PF: predicated region fallthrough
CT: control target
= control target key end

     0   :  { %7 = vsyncpa [#allocation3], 0  ;;  %s1303_s0 = inlined_call_operand.vmem [shape: f32[512,64], index: 0, kind: input, shape index: {}]   ;;  %s1304_s1 = inlined_call_operand.vmem [shape: f32[64,256], index: 1, kind: input, shape index: {}]   ;;  %s1305_s2 = inlined_call_operand.hbm [shape: f32[512,256], index: 2, kind: output, shape index: {}]  }
   0x1   :  { %9 = vsyncpa [#allocation3 + $0x1], 0  ;;  %s973_s9 = smov 0   ;;  %s975_s10 = smov 0  }
   0x2   :  { %s977_s11 = smov 0   ;;  %s979_s12 = smov 0  }
   0x3   :  { %s981_s13 = smov 0   ;;  %s983_s14 = smov 0  }
   0x4 LB: > { %s753_s15 = sadd.s32 4294967295, %s952_s14   ;;  %s754_s16 = sadd.s32 4294967294, %s952_s14   ;;  %s952_s14 = sphi %s983_s14, %s15_s14   ;;  %s948_s13 = sphi %s981_s13, %s1312_s13   ;;  %s944_s12 = sphi %s979_s12, %s1311_s12   ;;  %s940_s11 = sphi %s977_s11, %s1310_s11   ;;  %s936_s10 = sphi %s975_s10, %s1309_s10   ;;  %s932_s9 = sphi %s973_s9, %s1308_s9  }
   0x5   : > { %s27_s17 = sadd.s32 1, %s948_s13  ;;  %s88_s18 = sadd.s32 1, %s940_s11 }
   0x6   : > { %p29_p0 = scmp.ge.s32.totalorder %s27_s17, 2  ;;  %p98_p1 = scmp.ne.s32.totalorder %s940_s11, %s936_s10 }
   0x7   : > { %p99_p2 = scmp.eq.s32.totalorder %s753_s15, 1  ;;  %p104_p3 = scmp.ne.s32.totalorder %s936_s10, %s932_s9 }
   0x8   : > { %s1314_s17 = smov (%p29_p0, %s27_s17), 0  ;;  %p105_p5 = scmp.eq.s32.totalorder %s754_s16, 1 }
   0x9   : > { %p1013_p4 = por %p99_p2, %p98_p1  ;;  %s83_s20 = ssub.s32 %s948_s13, %s1314_s17 }
   0xa   : > { %p758_p6 = scmp.ge.s32.totalorder %s952_s14, 1  ;;  %p86_p7 = scmp.eq.s32.totalorder %s83_s20, 0 }
   0xb   : > { %p1020_p8 = por %p105_p5, %p104_p3  ;;  %p141_p9 = scmp.lt.s32.totalorder %s952_s14, 3 }
   0xc   : > { %s1026_s22 = scalar_select %p86_p7, %s940_s11, %s88_s18  }
   0xd   : > { %p142_p10 = pnand %p758_p6, %p141_p9 }
   0xe   : > { %s760_s29 = sshll.u32 (!%p142_p10), %s944_s12, 5  ;;  %s165_s24 = sand.u32 (!%p142_p10), 1, %s936_s10  }
   0xf   : > { %145 = sbr.rel (%p142_p10) target bundleno = 307 (0x133), region = 28  ;;  %p169_p11 = scmp.lt.s32.totalorder (!%p142_p10), %s760_s29, 63 }
  0x10   : > { %s759_s25 = sshll.u32 (!%p142_p10), %s165_s24, 9  ;;  %s801_s27 = sshll.u32 (!%p142_p10), %s944_s12, 13 }
  0x11   : > { %s1181_s26 = scalar_lea.vmem (!%p142_p10), [#allocation2], %s759_s25  ;;  %s1248_s4 = scalar_lea.hbm (!%p142_p10), %s1305_s2, %s801_s27 }
  0x12   : > { %s665_s28 = sshll.u32 (!%p142_p10), %s1181_s26, 4  ;;  %s1258_s12 = scalar_lea.sflag (!%p142_p10), [#allocation3], %s165_s24  ;;  %s1250_s28 = int_to_ptr.vmem [resolvable:$true] %s665_s28 }
  0x13   : > { %s876_s5 = scalar_lea.vmem (!%p142_p10), %s1250_s28, 8192  ;;  %s955_s6 = smov (!%p142_p10), [#allocation2]  }
  0x14   : > { %v229_v0 = vld [vmem:[%s1304_s1 + $0x78] sm:$0xff]  ;;  %v228_v1 = vld [vmem:[%s1304_s1 + $0x70] sm:$0xff]  ;;  %v227_v2 = vld [vmem:[%s1304_s1 + $0x68] sm:$0xff]  ;;  %s1316_s29 = smov (!%p169_p11, %s760_s29), 63  ;;  %vm230_vm0 = vcmask 523264   ;;  %v954_v18 = vmov 0.0   ;;  %p877_p12 = scmp.ne.s32.totalorder %s1250_s28, %s876_s5 }
  0x15   : > { %343 = vmatprep.subr.mxu0 %v229_v0  ;;  %802 = vmatprep.subr.mxu1 %v229_v0  ;;  %v226_v3 = vld [vmem:[%s1304_s1 + $0x60] sm:$0xff]  ;;  %v225_v4 = vld [vmem:[%s1304_s1 + $0x58] sm:$0xff]  ;;  %v224_v5 = vld [vmem:[%s1304_s1 + $0x50] sm:$0xff]  ;;  %s761_s3 = sshll.u32 %s1316_s29, 3  ;;  %s880_s7 = sshll.u32 %s955_s6, 4  ;;  %s881_s7 = int_to_ptr.vmem [resolvable:$false] %s880_s7 }
  0x16   : > { %344 = vmatpush1.msra.mxu0 %v228_v1  ;;  %810 = vmatpush1.msra.mxu1 %v228_v1  ;;  %v223_v6 = vld [vmem:[%s1304_s1 + $0x48] sm:$0xff]  ;;  %v222_v7 = vld [vmem:[%s1304_s1 + $0x40] sm:$0xff]  ;;  %v221_v8 = vld [vmem:[%s1304_s1 + $0x38] sm:$0xff]  ;;  %s1077_s18 = scalar_lea.vmem %s1303_s0, %s761_s3  ;;  %p878_p13 = pnand %p877_p12, %p1013_p4 }
  0x17   : > { %345 = vmatprep.subr.mxu0 %v227_v2  ;;  %803 = vmatprep.subr.mxu1 %v227_v2  ;;  %v220_v9 = vld [vmem:[%s1304_s1 + $0x30] sm:$0xff]  ;;  %v219_v10 = vld [vmem:[%s1304_s1 + $0x28] sm:$0xff]  ;;  %v218_v11 = vld [vmem:[%s1304_s1 + $0x20] sm:$0xff]  ;;  %s882_s8 = scalar_lea.vmem %s881_s7, 16384  ;;  %p883_p1 = scmp.lt.s32.totalorder %s1250_s28, %s881_s7 }
  0x18   : > { %346 = vmatpush1.msra.mxu0 %v226_v3  ;;  %811 = vmatpush1.msra.mxu1 %v226_v3  ;;  %v217_v12 = vld [vmem:[%s1304_s1 + $0x18] sm:$0xff]  ;;  %v216_v13 = vld [vmem:[%s1304_s1 + $0x10] sm:$0xff]  ;;  %v215_v14 = vld [vmem:[%s1304_s1 + $0x8] sm:$0xff]  ;;  %p879_p0 = pneg %p878_p13  ;;  %p884_p2 = scmp.lt.s32.totalorder %s882_s8, %s876_s5 }
  0x19   : > { %347 = vmatprep.subr.mxu0 %v225_v4  ;;  %804 = vmatprep.subr.mxu1 %v225_v4  ;;  %v214_v15 = vld [vmem:[%s1304_s1] sm:$0xff]  ;;  %v183_v19 = vld [vmem:[%s1077_s18 + $0x8] sm:$0xff]  ;;  %v184_v21 = vld [vmem:[%s1077_s18 + $0x10] sm:$0xff] }
  0x1a   : > { %348 = vmatpush1.msra.mxu0 %v224_v5  ;;  %812 = vmatpush1.msra.mxu1 %v224_v5  ;;  %v182_v16 = vld [vmem:[%s1077_s18] sm:$0xff]  ;;  %v199_v20 = vld [vmem:[%s1077_s18 + $0x88] sm:$0xff]  ;;  %v200_v22 = vld [vmem:[%s1077_s18 + $0x90] sm:$0xff]  ;;  %p885_p3 = por %p884_p2, %p883_p1 }
  0x1b   : > { %349 = vmatprep.subr.mxu0 %v223_v6  ;;  %805 = vmatprep.subr.mxu1 %v223_v6  ;;  %v198_v17 = vld [vmem:[%s1077_s18 + $0x80] sm:$0xff]  ;;  %v185_v23 = vld [vmem:[%s1077_s18 + $0x18] sm:$0xff]  ;;  %v187_v27 = vld [vmem:[%s1077_s18 + $0x28] sm:$0xff] }
  0x1c   : > { %350 = vmatpush1.msra.mxu0 %v222_v7  ;;  %813 = vmatpush1.msra.mxu1 %v222_v7  ;;  %v201_v24 = vld [vmem:[%s1077_s18 + $0x98] sm:$0xff]  ;;  %v186_v25 = vld [vmem:[%s1077_s18 + $0x20] sm:$0xff]  ;;  %v203_v28 = vld [vmem:[%s1077_s18 + $0xa8] sm:$0xff]  ;;  %p886_p5 = pnand %p885_p3, %p879_p0 }
  0x1d   : > { %351 = vmatprep.subr.mxu0 %v221_v8  ;;  %806 = vmatprep.subr.mxu1 %v221_v8  ;;  %v202_v26 = vld [vmem:[%s1077_s18 + $0xa0] sm:$0xff]  ;;  %v188_v29 = vld [vmem:[%s1077_s18 + $0x30] sm:$0xff]  ;;  %v189_v31 = vld [vmem:[%s1077_s18 + $0x38] sm:$0xff] }
  0x1e   : > { %352 = vmatpush1.msra.mxu0 %v220_v9  ;;  %814 = vmatpush1.msra.mxu1 %v220_v9  ;;  %v204_v30 = vld [vmem:[%s1077_s18 + $0xb0] sm:$0xff]  ;;  %v205_v32 = vld [vmem:[%s1077_s18 + $0xb8] sm:$0xff]  ;;  %v190_v33 = vld [vmem:[%s1077_s18 + $0x40] sm:$0xff] }
  0x1f   : > { %353 = vmatprep.subr.mxu0 %v219_v10  ;;  %807 = vmatprep.subr.mxu1 %v219_v10  ;;  %v206_v34 = vld [vmem:[%s1077_s18 + $0xc0] sm:$0xff]  ;;  %v191_v35 = vld [vmem:[%s1077_s18 + $0x48] sm:$0xff]  ;;  %v192_v37 = vld [vmem:[%s1077_s18 + $0x50] sm:$0xff] }
  0x20   : > { %354 = vmatpush1.msra.mxu0 %v218_v11  ;;  %815 = vmatpush1.msra.mxu1 %v218_v11  ;;  %v207_v36 = vld [vmem:[%s1077_s18 + $0xc8] sm:$0xff]  ;;  %v208_v38 = vld [vmem:[%s1077_s18 + $0xd0] sm:$0xff]  ;;  %v193_v39 = vld [vmem:[%s1077_s18 + $0x58] sm:$0xff] }
  0x21   : > { %355 = vmatprep.subr.mxu0 %v217_v12  ;;  %808 = vmatprep.subr.mxu1 %v217_v12  ;;  %v209_v40 = vld [vmem:[%s1077_s18 + $0xd8] sm:$0xff]  ;;  %v194_v41 = vld [vmem:[%s1077_s18 + $0x60] sm:$0xff]  ;;  %v195_v43 = vld [vmem:[%s1077_s18 + $0x68] sm:$0xff] }
  0x22   : > { %356 = vmatpush1.msra.mxu0 %v216_v13  ;;  %816 = vmatpush1.msra.mxu1 %v216_v13  ;;  %v210_v42 = vld [vmem:[%s1077_s18 + $0xe0] sm:$0xff]  ;;  %v211_v44 = vld [vmem:[%s1077_s18 + $0xe8] sm:$0xff]  ;;  %v196_v45 = vld [vmem:[%s1077_s18 + $0x70] sm:$0xff] }
  0x23   : > { %357 = vmatprep.subr.mxu0 %v215_v14  ;;  %809 = vmatprep.subr.mxu1 %v215_v14  ;;  %v212_v46 = vld [vmem:[%s1077_s18 + $0xf0] sm:$0xff]  ;;  %v197_v47 = vld [vmem:[%s1077_s18 + $0x78] sm:$0xff] }
  0x24   : > { %358 = vmatpush1.msra.mxu0 %v214_v15  ;;  %817 = vmatpush1.msra.mxu1 %v214_v15  ;;  %v213_v48 = vld [vmem:[%s1077_s18 + $0xf8] sm:$0xff] }
  0x25   : > { %391 = vmatprep.mubr.f32.mxu0 %v954_v18  ;;  %487 = vmatprep.mubr.f32.mxu1 %v954_v18 }
  0x26   : > { %762 = vmatmul.mubr.msk.f32.vlgmr.msra.gmra.mxu0 %vm230_vm0, %v182_v16  ;;  %778 = vmatmul.mubr.msk.f32.vlgmr.msra.gmra.mxu1 %vm230_vm0, %v198_v17 }
  0x27   : > { %397 = vmatprep.mubr.f32.mxu0 %v954_v18  ;;  %493 = vmatprep.mubr.f32.mxu1 %v954_v18 }
  0x2a   : > { %763 = vmatmul.mubr.msk.f32.gmra.mxu0 %vm230_vm0, %v183_v19  ;;  %779 = vmatmul.mubr.msk.f32.gmra.mxu1 %vm230_vm0, %v199_v20 }
  0x2b   : > { %403 = vmatprep.mubr.f32.mxu0 %v954_v18  ;;  %499 = vmatprep.mubr.f32.mxu1 %v954_v18 }
  0x2e   : > { %764 = vmatmul.mubr.msk.f32.gmra.mxu0 %vm230_vm0, %v184_v21  ;;  %780 = vmatmul.mubr.msk.f32.gmra.mxu1 %vm230_vm0, %v200_v22 }
  0x2f   : > { %409 = vmatprep.mubr.f32.mxu0 %v954_v18  ;;  %505 = vmatprep.mubr.f32.mxu1 %v954_v18 }
  0x32   : > { %765 = vmatmul.mubr.msk.f32.gmra.mxu0 %vm230_vm0, %v185_v23  ;;  %781 = vmatmul.mubr.msk.f32.gmra.mxu1 %vm230_vm0, %v201_v24 }
  0x33   : > { %415 = vmatprep.mubr.f32.mxu0 %v954_v18  ;;  %511 = vmatprep.mubr.f32.mxu1 %v954_v18 }
  0x36   : > { %766 = vmatmul.mubr.msk.f32.gmra.mxu0 %vm230_vm0, %v186_v25  ;;  %782 = vmatmul.mubr.msk.f32.gmra.mxu1 %vm230_vm0, %v202_v26 }
  0x37   : > { %421 = vmatprep.mubr.f32.mxu0 %v954_v18  ;;  %517 = vmatprep.mubr.f32.mxu1 %v954_v18 }
  0x3a   : > { %767 = vmatmul.mubr.msk.f32.gmra.mxu0 %vm230_vm0, %v187_v27  ;;  %783 = vmatmul.mubr.msk.f32.gmra.mxu1 %vm230_vm0, %v203_v28 }
  0x3b   : > { %427 = vmatprep.mubr.f32.mxu0 %v954_v18  ;;  %523 = vmatprep.mubr.f32.mxu1 %v954_v18 }
  0x3e   : > { %768 = vmatmul.mubr.msk.f32.gmra.mxu0 %vm230_vm0, %v188_v29  ;;  %784 = vmatmul.mubr.msk.f32.gmra.mxu1 %vm230_vm0, %v204_v30 }
  0x3f   : > { %433 = vmatprep.mubr.f32.mxu0 %v954_v18  ;;  %529 = vmatprep.mubr.f32.mxu1 %v954_v18 }
  0x42   : > { %769 = vmatmul.mubr.msk.f32.gmra.mxu0 %vm230_vm0, %v189_v31  ;;  %785 = vmatmul.mubr.msk.f32.gmra.mxu1 %vm230_vm0, %v205_v32 }
  0x43   : > { %439 = vmatprep.mubr.f32.mxu0 %v954_v18  ;;  %535 = vmatprep.mubr.f32.mxu1 %v954_v18 }
  0x46   : > { %770 = vmatmul.mubr.msk.f32.gmra.mxu0 %vm230_vm0, %v190_v33  ;;  %786 = vmatmul.mubr.msk.f32.gmra.mxu1 %vm230_vm0, %v206_v34 }
  0x47   : > { %445 = vmatprep.mubr.f32.mxu0 %v954_v18  ;;  %541 = vmatprep.mubr.f32.mxu1 %v954_v18 }
  0x4a   : > { %771 = vmatmul.mubr.msk.f32.gmra.mxu0 %vm230_vm0, %v191_v35  ;;  %787 = vmatmul.mubr.msk.f32.gmra.mxu1 %vm230_vm0, %v207_v36 }
  0x4b   : > { %451 = vmatprep.mubr.f32.mxu0 %v954_v18  ;;  %547 = vmatprep.mubr.f32.mxu1 %v954_v18 }
  0x4e   : > { %772 = vmatmul.mubr.msk.f32.gmra.mxu0 %vm230_vm0, %v192_v37  ;;  %788 = vmatmul.mubr.msk.f32.gmra.mxu1 %vm230_vm0, %v208_v38 }
  0x4f   : > { %457 = vmatprep.mubr.f32.mxu0 %v954_v18  ;;  %553 = vmatprep.mubr.f32.mxu1 %v954_v18 }
  0x52   : > { %773 = vmatmul.mubr.msk.f32.gmra.mxu0 %vm230_vm0, %v193_v39  ;;  %789 = vmatmul.mubr.msk.f32.gmra.mxu1 %vm230_vm0, %v209_v40 }
  0x53   : > { %463 = vmatprep.mubr.f32.mxu0 %v954_v18  ;;  %559 = vmatprep.mubr.f32.mxu1 %v954_v18 }
  0x56   : > { %774 = vmatmul.mubr.msk.f32.gmra.mxu0 %vm230_vm0, %v194_v41  ;;  %790 = vmatmul.mubr.msk.f32.gmra.mxu1 %vm230_vm0, %v210_v42 }
  0x57   : > { %469 = vmatprep.mubr.f32.mxu0 %v954_v18  ;;  %565 = vmatprep.mubr.f32.mxu1 %v954_v18 }
  0x5a   : > { %775 = vmatmul.mubr.msk.f32.gmra.mxu0 %vm230_vm0, %v195_v43  ;;  %791 = vmatmul.mubr.msk.f32.gmra.mxu1 %vm230_vm0, %v211_v44 }
  0x5b   : > { %475 = vmatprep.mubr.f32.mxu0 %v954_v18  ;;  %571 = vmatprep.mubr.f32.mxu1 %v954_v18 }
  0x5e   : > { %776 = vmatmul.mubr.msk.f32.gmra.mxu0 %vm230_vm0, %v196_v45  ;;  %792 = vmatmul.mubr.msk.f32.gmra.mxu1 %vm230_vm0, %v212_v46 }
  0x5f   : > { %481 = vmatprep.mubr.f32.mxu0 %v954_v18  ;;  %577 = vmatprep.mubr.f32.mxu1 %v954_v18 }
  0x62   : > { %777 = vmatmul.mubr.msk.f32.gmra.mxu0 %vm230_vm0, %v197_v47  ;;  %793 = vmatmul.mubr.msk.f32.gmra.mxu1 %vm230_vm0, %v213_v48 }
  0xe6   : > { %v393_v49 = vpop.f32.mrf.mxu0  ;;  %v489_v50 = vpop.f32.mrf.mxu1 }
  0xe7   : > { %584 = vst [vmem:[%s1181_s26] sm:$0xff] %v393_v49  ;;  %616 = vst [vmem:[%s1181_s26 + $0x100] sm:$0xff] %v489_v50 }
  0xe8   : > { %v395_v51 = vpop.f32.mrf.mxu0  ;;  %v491_v52 = vpop.f32.mrf.mxu1 }
  0xe9   : > { %585 = vst [vmem:[%s1181_s26 + $0x8] sm:$0xff] %v395_v51  ;;  %617 = vst [vmem:[%s1181_s26 + $0x108] sm:$0xff] %v491_v52 }
  0xea   : > { %v399_v53 = vpop.f32.mrf.mxu0  ;;  %v495_v54 = vpop.f32.mrf.mxu1 }
  0xeb   : > { %586 = vst [vmem:[%s1181_s26 + $0x10] sm:$0xff] %v399_v53  ;;  %618 = vst [vmem:[%s1181_s26 + $0x110] sm:$0xff] %v495_v54 }
  0xec   : > { %v401_v55 = vpop.f32.mrf.mxu0  ;;  %v497_v56 = vpop.f32.mrf.mxu1 }
  0xed   : > { %587 = vst [vmem:[%s1181_s26 + $0x18] sm:$0xff] %v401_v55  ;;  %619 = vst [vmem:[%s1181_s26 + $0x118] sm:$0xff] %v497_v56 }
  0xee   : > { %v405_v57 = vpop.f32.mrf.mxu0  ;;  %v501_v58 = vpop.f32.mrf.mxu1 }
  0xef   : > { %588 = vst [vmem:[%s1181_s26 + $0x20] sm:$0xff] %v405_v57  ;;  %620 = vst [vmem:[%s1181_s26 + $0x120] sm:$0xff] %v501_v58 }
  0xf0   : > { %v407_v59 = vpop.f32.mrf.mxu0  ;;  %v503_v60 = vpop.f32.mrf.mxu1 }
  0xf1   : > { %589 = vst [vmem:[%s1181_s26 + $0x28] sm:$0xff] %v407_v59  ;;  %621 = vst [vmem:[%s1181_s26 + $0x128] sm:$0xff] %v503_v60 }
  0xf2   : > { %v411_v61 = vpop.f32.mrf.mxu0  ;;  %v507_v62 = vpop.f32.mrf.mxu1 }
  0xf3   : > { %590 = vst [vmem:[%s1181_s26 + $0x30] sm:$0xff] %v411_v61  ;;  %622 = vst [vmem:[%s1181_s26 + $0x130] sm:$0xff] %v507_v62 }
  0xf4   : > { %v413_v63 = vpop.f32.mrf.mxu0  ;;  %v509_v0 = vpop.f32.mrf.mxu1 }
  0xf5   : > { %591 = vst [vmem:[%s1181_s26 + $0x38] sm:$0xff] %v413_v63  ;;  %623 = vst [vmem:[%s1181_s26 + $0x138] sm:$0xff] %v509_v0 }
  0xf6   : > { %v417_v1 = vpop.f32.mrf.mxu0  ;;  %v513_v2 = vpop.f32.mrf.mxu1 }
  0xf7   : > { %592 = vst [vmem:[%s1181_s26 + $0x40] sm:$0xff] %v417_v1  ;;  %624 = vst [vmem:[%s1181_s26 + $0x140] sm:$0xff] %v513_v2 }
  0xf8   : > { %v419_v3 = vpop.f32.mrf.mxu0  ;;  %v515_v4 = vpop.f32.mrf.mxu1 }
  0xf9   : > { %593 = vst [vmem:[%s1181_s26 + $0x48] sm:$0xff] %v419_v3  ;;  %625 = vst [vmem:[%s1181_s26 + $0x148] sm:$0xff] %v515_v4 }
  0xfa   : > { %v423_v5 = vpop.f32.mrf.mxu0  ;;  %v519_v6 = vpop.f32.mrf.mxu1 }
  0xfb   : > { %594 = vst [vmem:[%s1181_s26 + $0x50] sm:$0xff] %v423_v5  ;;  %626 = vst [vmem:[%s1181_s26 + $0x150] sm:$0xff] %v519_v6 }
  0xfc   : > { %v425_v7 = vpop.f32.mrf.mxu0  ;;  %v521_v8 = vpop.f32.mrf.mxu1 }
  0xfd   : > { %595 = vst [vmem:[%s1181_s26 + $0x58] sm:$0xff] %v425_v7  ;;  %627 = vst [vmem:[%s1181_s26 + $0x158] sm:$0xff] %v521_v8 }
  0xfe   : > { %v429_v9 = vpop.f32.mrf.mxu0  ;;  %v525_v10 = vpop.f32.mrf.mxu1 }
  0xff   : > { %596 = vst [vmem:[%s1181_s26 + $0x60] sm:$0xff] %v429_v9  ;;  %628 = vst [vmem:[%s1181_s26 + $0x160] sm:$0xff] %v525_v10 }
 0x100   : > { %v431_v11 = vpop.f32.mrf.mxu0  ;;  %v527_v12 = vpop.f32.mrf.mxu1 }
 0x101   : > { %597 = vst [vmem:[%s1181_s26 + $0x68] sm:$0xff] %v431_v11  ;;  %629 = vst [vmem:[%s1181_s26 + $0x168] sm:$0xff] %v527_v12 }
 0x102   : > { %v435_v13 = vpop.f32.mrf.mxu0  ;;  %v531_v14 = vpop.f32.mrf.mxu1 }
 0x103   : > { %598 = vst [vmem:[%s1181_s26 + $0x70] sm:$0xff] %v435_v13  ;;  %630 = vst [vmem:[%s1181_s26 + $0x170] sm:$0xff] %v531_v14 }
 0x104   : > { %v437_v15 = vpop.f32.mrf.mxu0  ;;  %v533_v16 = vpop.f32.mrf.mxu1 }
 0x105   : > { %599 = vst [vmem:[%s1181_s26 + $0x78] sm:$0xff] %v437_v15  ;;  %631 = vst [vmem:[%s1181_s26 + $0x178] sm:$0xff] %v533_v16 }
 0x106   : > { %v441_v17 = vpop.f32.mrf.mxu0  ;;  %v537_v18 = vpop.f32.mrf.mxu1 }
 0x107   : > { %600 = vst [vmem:[%s1181_s26 + $0x80] sm:$0xff] %v441_v17  ;;  %632 = vst [vmem:[%s1181_s26 + $0x180] sm:$0xff] %v537_v18 }
 0x108   : > { %v443_v19 = vpop.f32.mrf.mxu0  ;;  %v539_v20 = vpop.f32.mrf.mxu1 }
 0x109   : > { %601 = vst [vmem:[%s1181_s26 + $0x88] sm:$0xff] %v443_v19  ;;  %633 = vst [vmem:[%s1181_s26 + $0x188] sm:$0xff] %v539_v20 }
 0x10a   : > { %v447_v21 = vpop.f32.mrf.mxu0  ;;  %v543_v22 = vpop.f32.mrf.mxu1 }
 0x10b   : > { %602 = vst [vmem:[%s1181_s26 + $0x90] sm:$0xff] %v447_v21  ;;  %634 = vst [vmem:[%s1181_s26 + $0x190] sm:$0xff] %v543_v22 }
 0x10c   : > { %v449_v23 = vpop.f32.mrf.mxu0  ;;  %v545_v24 = vpop.f32.mrf.mxu1 }
 0x10d   : > { %603 = vst [vmem:[%s1181_s26 + $0x98] sm:$0xff] %v449_v23  ;;  %635 = vst [vmem:[%s1181_s26 + $0x198] sm:$0xff] %v545_v24 }
 0x10e   : > { %v453_v25 = vpop.f32.mrf.mxu0  ;;  %v549_v26 = vpop.f32.mrf.mxu1 }
 0x10f   : > { %604 = vst [vmem:[%s1181_s26 + $0xa0] sm:$0xff] %v453_v25  ;;  %636 = vst [vmem:[%s1181_s26 + $0x1a0] sm:$0xff] %v549_v26 }
 0x110   : > { %v455_v27 = vpop.f32.mrf.mxu0  ;;  %v551_v28 = vpop.f32.mrf.mxu1 }
 0x111   : > { %605 = vst [vmem:[%s1181_s26 + $0xa8] sm:$0xff] %v455_v27  ;;  %637 = vst [vmem:[%s1181_s26 + $0x1a8] sm:$0xff] %v551_v28 }
 0x112   : > { %v459_v29 = vpop.f32.mrf.mxu0  ;;  %v555_v30 = vpop.f32.mrf.mxu1 }
 0x113   : > { %606 = vst [vmem:[%s1181_s26 + $0xb0] sm:$0xff] %v459_v29  ;;  %638 = vst [vmem:[%s1181_s26 + $0x1b0] sm:$0xff] %v555_v30 }
 0x114   : > { %v461_v31 = vpop.f32.mrf.mxu0  ;;  %v557_v32 = vpop.f32.mrf.mxu1 }
 0x115   : > { %607 = vst [vmem:[%s1181_s26 + $0xb8] sm:$0xff] %v461_v31  ;;  %639 = vst [vmem:[%s1181_s26 + $0x1b8] sm:$0xff] %v557_v32 }
 0x116   : > { %v465_v33 = vpop.f32.mrf.mxu0  ;;  %v561_v34 = vpop.f32.mrf.mxu1 }
 0x117   : > { %608 = vst [vmem:[%s1181_s26 + $0xc0] sm:$0xff] %v465_v33  ;;  %640 = vst [vmem:[%s1181_s26 + $0x1c0] sm:$0xff] %v561_v34 }
 0x118   : > { %v467_v35 = vpop.f32.mrf.mxu0  ;;  %v563_v36 = vpop.f32.mrf.mxu1 }
 0x119   : > { %609 = vst [vmem:[%s1181_s26 + $0xc8] sm:$0xff] %v467_v35  ;;  %641 = vst [vmem:[%s1181_s26 + $0x1c8] sm:$0xff] %v563_v36 }
 0x11a   : > { %v471_v37 = vpop.f32.mrf.mxu0  ;;  %v567_v38 = vpop.f32.mrf.mxu1 }
 0x11b   : > { %610 = vst [vmem:[%s1181_s26 + $0xd0] sm:$0xff] %v471_v37  ;;  %642 = vst [vmem:[%s1181_s26 + $0x1d0] sm:$0xff] %v567_v38 }
 0x11c   : > { %v473_v39 = vpop.f32.mrf.mxu0  ;;  %v569_v40 = vpop.f32.mrf.mxu1 }
 0x11d   : > { %611 = vst [vmem:[%s1181_s26 + $0xd8] sm:$0xff] %v473_v39  ;;  %643 = vst [vmem:[%s1181_s26 + $0x1d8] sm:$0xff] %v569_v40 }
 0x11e   : > { %v477_v41 = vpop.f32.mrf.mxu0  ;;  %v573_v42 = vpop.f32.mrf.mxu1 }
 0x11f   : > { %612 = vst [vmem:[%s1181_s26 + $0xe0] sm:$0xff] %v477_v41  ;;  %644 = vst [vmem:[%s1181_s26 + $0x1e0] sm:$0xff] %v573_v42 }
 0x120   : > { %v479_v43 = vpop.f32.mrf.mxu0  ;;  %v575_v44 = vpop.f32.mrf.mxu1 }
 0x121   : > { %613 = vst [vmem:[%s1181_s26 + $0xe8] sm:$0xff] %v479_v43  ;;  %645 = vst [vmem:[%s1181_s26 + $0x1e8] sm:$0xff] %v575_v44 }
 0x122   : > { %v483_v45 = vpop.f32.mrf.mxu0  ;;  %v579_v46 = vpop.f32.mrf.mxu1 }
 0x123   : > { %614 = vst [vmem:[%s1181_s26 + $0xf0] sm:$0xff] %v483_v45  ;;  %646 = vst [vmem:[%s1181_s26 + $0x1f0] sm:$0xff] %v579_v46 }
 0x124   : > { %v485_v47 = vpop.f32.mrf.mxu0  ;;  %v581_v48 = vpop.f32.mrf.mxu1 }
 0x125   : > { %615 = vst [vmem:[%s1181_s26 + $0xf8] sm:$0xff] %v485_v47  ;;  %647 = vst [vmem:[%s1181_s26 + $0x1f8] sm:$0xff] %v581_v48 }
 0x126   : > { %889 = shalt.err (!%p886_p5)
}
 0x127   : > { %s890_s15 = scalar_lea.hbm %s1248_s4, 8192  ;;  %s894_s18 = scalar_lea.hbm %s1305_s2, 16384 }
 0x128   : > { %p891_p6 = scmp.ne.s32.totalorder %s1248_s4, %s890_s15  ;;  %p895_p10 = scmp.lt.s32.totalorder %s1248_s4, %s1305_s2 }
 0x129   : > { %p896_p11 = scmp.lt.s32.totalorder %s894_s18, %s890_s15 }
 0x12a   : > { %p892_p7 = pnand %p891_p6, %p1013_p4 }
 0x12b   : > { %p897_p12 = por %p896_p11, %p895_p10 }
 0x12c   : > { %p893_p9 = pneg %p892_p7 }
 0x12e   : > { %p898_p13 = pnand %p897_p12, %p893_p9 }
 0x130   : > { %901 = shalt.err (!%p898_p13)
}
 0x131   : > { %s956_s24 = smov 256   ;;  %s957_s25 = smov 16  }
 0x132   : > { %818 = dma.vmem_to_hbm [thread:$0]  (%p1013_p4), %s1250_s28, 8192, %s1248_s4, %s1258_s12, %s956_s24, %s956_s24, %s957_s25  }
 0x133 PF: > { %p824_p0 = scmp.ge.s32.totalorder %s952_s14, 2  ;;  %s680_s26 = sand.u32 1, %s932_s9  }
 0x134   : > { %s681_s27 = scalar_lea.sflag [#allocation3], %s680_s26 }
 0x135   : > { %p821_p1 = pnand %p824_p0, %p1020_p8 }
 0x137   : > { %p822_p2 = pneg %p821_p1 }
 0x139   : > { %927 = dma.done.wait (%p822_p2), %s681_s27, 8192  }
 0x13a   : > { %929 = vsyncadd (%p822_p2), %s681_s27, 4294959104  ;;  %s15_s14 = sadd.s32 1, %s952_s14   ;;  %s1308_s9 = smov %s936_s10 }
 0x13b   : > { %p12_p3 = scmp.ge.s32.totalorder %s15_s14, 4   ;;  %s1309_s10 = smov %s940_s11 }
 0x13c   : > { %s1310_s11 = smov %s1026_s22  ;;  %s1311_s12 = smov %s948_s13 }
 0x13d   : > { %s1312_s13 = smov %s1314_s17  ;;  %14 = sbr.rel (!%p12_p3) target bundleno = 4 (0x4), region = 66 }
 0x142   :  { %686 = vsyncpa [#allocation3], 1 }
 0x143   :  { %688 = vsyncpa [#allocation3 + $0x1], 1 }

</bundles_post_ra>
